<compile_context>
chip_gen: v7x
topology: tpu7x:2x2x1
jax: 0.10.0
libtpu: 0.0.40
codegen_flags: <defaults>
</compile_context>

<pallas_src>
import functools

import jax
import jax.numpy as jnp
from jax.experimental import pallas as pl
from jax.experimental.pallas import tpu as pltpu


# ----------------------------------------------------------------------------
# Kernels
# ----------------------------------------------------------------------------
def _zen_ln_rowwise_kernel(x_ref, y_ref, var_ref, *, eps):
    """General path: one row per (sublane) row, reduce over the lane axis."""
    x = x_ref[...].astype(jnp.float32)                       # (TR, C)
    mean = jnp.mean(x, axis=-1, keepdims=True)               # (TR, 1)
    centered = x - mean
    var = jnp.mean(centered * centered, axis=-1, keepdims=True)
    inv = jax.lax.rsqrt(var + eps)                           # EUP slot
    y_ref[...] = (centered * inv).astype(y_ref.dtype)
    var_ref[...] = var.astype(var_ref.dtype)


def _zen_ln_packed_kernel(x_ref, y_ref, var_ref, *, eps, c):
    """Lane-packed path: k = kc // c original rows share one lane group.

    Each packed row holds k contiguous original rows along the lane axis in
    aligned segments of width c (c is a power of two because c | 128).  The
    per-segment mean/variance are computed with an exact butterfly all-reduce
    (x[j] + x[j XOR s] for s = 1, 2, ..., c/2) built from static rolls and a
    lane-index select, keeping everything fully lane-dense.
    """
    x = x_ref[...].astype(jnp.float32)                       # (TR, kc)
    tr, kc = x_ref.shape
    k = kc // c
    lane = jax.lax.broadcasted_iota(jnp.int32, (1, kc), 1)

    def seg_allsum(v):
        # After the loop every lane holds the sum over its own c-wide segment.
        acc = v
        s = 1
        while s < c:
            fwd = jnp.roll(acc, kc - s, axis=1)   # lane j <- acc[j + s]
            bwd = jnp.roll(acc, s, axis=1)        # lane j <- acc[j - s]
            acc = acc + jnp.where((lane & s) == 0, fwd, bwd)
            s *= 2
        return acc

    inv_c = 1.0 / c
    mean_b = seg_allsum(x) * inv_c                           # per-segment mean
    centered = x - mean_b
    var_b = seg_allsum(centered * centered) * inv_c          # per-segment var
    inv = jax.lax.rsqrt(var_b + eps)
    y_ref[...] = (centered * inv).astype(y_ref.dtype)

    # One variance per original row: lane s*c of segment s (all lanes of a
    # segment hold the same value, so a width-1 static slice per segment).
    cols = [var_b[:, s * c:s * c + 1] for s in range(k)]
    seg_var = cols[0] if k == 1 else jnp.concatenate(cols, axis=1)  # (TR, k)
    var_ref[...] = seg_var.astype(var_ref.dtype)


# ----------------------------------------------------------------------------
# Tiling / per-generation heuristics
# ----------------------------------------------------------------------------
def _tpu_defaults():
    """(target_block_bytes, vmem_limit_bytes, prefer_multicore)."""
    vmem_cap = 64 * 1024 * 1024           # conservative: v7x per-TC VMEM
    try:
        info = pltpu.get_tpu_info()
        vmem_cap = int(getattr(info, "vmem_capacity_bytes", vmem_cap))
    except Exception:
        pass
    if vmem_cap >= 96 * 1024 * 1024:      # v5e / v6e: 128 MiB VMEM, single TC
        target_block_bytes = 6 * 1024 * 1024
        prefer_multicore = False
    else:                                  # v7x: 64 MiB VMEM, two TensorCores
        target_block_bytes = 4 * 1024 * 1024
        prefer_multicore = True
    vmem_limit_bytes = max(40 * 1024 * 1024,
                           min(int(0.75 * vmem_cap), 100 * 1024 * 1024))
    return target_block_bytes, vmem_limit_bytes, prefer_multicore


def _pick_row_tile(n_rows, lane_width, target_block_bytes, prefer_multicore,
                   row_tile=None):
    """Rows per block.  Budget is in f32 bytes (the f32 temporaries dominate)."""
    if row_tile is not None:
        rt = max(8, (int(row_tile) // 8) * 8)
        return min(rt, n_rows)
    if n_rows <= 128:
        return n_rows                      # single full-extent block
    rt = target_block_bytes // (4 * max(1, lane_width))
    rt = max(128, min(rt, 16384))
    rt = (rt // 128) * 128
    rt = min(rt, (n_rows // 128) * 128)
    if prefer_multicore:
        # v7x: the row axis shards across two TensorCores -> prefer >= 2 and
        # an even number of grid steps so both cores stay at the HBM roofline.
        if pl.cdiv(n_rows, rt) == 1 and n_rows >= 256:
            rt = max(128, ((pl.cdiv(n_rows, 2) + 127) // 128) * 128)
        steps = pl.cdiv(n_rows, rt)
        if steps > 1 and steps % 2 == 1:
            alt = ((pl.cdiv(n_rows, steps + 1) + 127) // 128) * 128
            if alt >= 128 and pl.cdiv(n_rows, alt) % 2 == 0:
                rt = alt
    return rt


# ----------------------------------------------------------------------------
# Wrapper
# ----------------------------------------------------------------------------
@functools.partial(jax.jit, static_argnames=("eps", "row_tile"))
def zen_layer_norm(x, eps=1e-5, row_tile=None):
    """x: (L, N, C). Returns (normalized (L, N, C), sigma (L*N,))."""
    L, N, C = x.shape
    rows = L * N
    itemsize = jnp.dtype(x.dtype).itemsize
    x2d = x.reshape(rows, C)               # metadata-only under jit

    target_block_bytes, vmem_limit_bytes, prefer_multicore = _tpu_defaults()
    compiler_params = pltpu.CompilerParams(
        dimension_semantics=("parallel",),
        vmem_limit_bytes=vmem_limit_bytes,
    )
    cost = pl.CostEstimate(
        flops=int(8 * rows * C),
        transcendentals=int(rows),
        bytes_accessed=int(2 * rows * C * itemsize + rows * itemsize),
    )

    # Lane-packed path: pack k = 128 // C rows per 128-wide lane group.
    k = 128 // C if (0 < C < 128 and 128 % C == 0) else 1
    use_packed = (k > 1) and (k <= 16) and (rows % k == 0)

    if use_packed:
        kc = k * C                          # == 128
        prows = rows // k
        x_p = x2d.reshape(prows, kc)        # row-major: k rows per packed row
        rt = _pick_row_tile(prows, kc, target_block_bytes, prefer_multicore,
                            row_tile)
        grid = (pl.cdiv(prows, rt),)        # ragged tail handled by masking
        y_p, var_p = pl.pallas_call(
            functools.partial(_zen_ln_packed_kernel, eps=eps, c=C),
            out_shape=(
                jax.ShapeDtypeStruct((prows, kc), x.dtype),
                jax.ShapeDtypeStruct((prows, k), x.dtype),
            ),
            grid=grid,
            in_specs=[pl.BlockSpec((rt, kc), lambda i: (i, 0))],
            out_specs=(
                pl.BlockSpec((rt, kc), lambda i: (i, 0)),
                pl.BlockSpec((rt, k), lambda i: (i, 0)),
            ),
            compiler_params=compiler_params,
            cost_estimate=cost,
        )(x_p)
        out = y_p.reshape(L, N, C)
        sigma = var_p.reshape(rows)         # (prows, k) row-major == row order
        return out, sigma

    # General row-wise path (C >= 128, or packing not applicable).
    rt = _pick_row_tile(rows, max(C, 128), target_block_bytes,
                        prefer_multicore, row_tile)
    grid = (pl.cdiv(rows, rt),)             # no padding; tail block is masked
    y2d, var2d = pl.pallas_call(
        functools.partial(_zen_ln_rowwise_kernel, eps=eps),
        out_shape=(
            jax.ShapeDtypeStruct((rows, C), x.dtype),
            jax.ShapeDtypeStruct((rows, 1), x.dtype),
        ),
        grid=grid,
        in_specs=[pl.BlockSpec((rt, C), lambda i: (i, 0))],
        out_specs=(
            pl.BlockSpec((rt, C), lambda i: (i, 0)),
            pl.BlockSpec((rt, 1), lambda i: (i, 0)),
        ),
        compiler_params=compiler_params,
        cost_estimate=cost,
    )(x2d)
    out = y2d.reshape(L, N, C)
    sigma = var2d.reshape(rows)
    return out, sigma


# ----------------------------------------------------------------------------
# Reference + self-test
# ----------------------------------------------------------------------------
def _reference(x, eps=1e-5):
    mean = jnp.mean(x, axis=2, keepdims=True)
    var = jnp.mean(jnp.square(x - mean), axis=2, keepdims=True)
    return (x - mean) / jnp.sqrt(var + eps), var.reshape(-1)


def _check(x, eps=1e-5, row_tile=None):
    out, sigma = zen_layer_norm(x, eps=eps, row_tile=row_tile)
    out = jax.block_until_ready(out)
    sigma = jax.block_until_ready(sigma)
    ref_out, ref_sigma = _reference(x, eps=eps)
    assert out.shape == x.shape
    assert sigma.shape == (x.shape[0] * x.shape[1],)
    assert jnp.allclose(out, ref_out, atol=1e-5, rtol=1e-5)
    assert jnp.allclose(sigma, ref_sigma, atol=1e-5, rtol=1e-5)


if __name__ == "__main__":
    key = jax.random.PRNGKey(0)
    k1, k2, k3 = jax.random.split(key, 3)

    # 1) Shipped configuration (L, N, C) = (8, 2, 32): lane-packed path (C<128).
    _check(jax.random.normal(k1, (8, 2, 32), dtype=jnp.float32))

    # 2) Wide channels -> general row-wise path, with a row tile that does NOT
    #    divide the row count (25 rows, tile 8) to exercise the masked
    #    out-of-bounds tail block on device.
    _check(jax.random.normal(k2, (5, 5, 256), dtype=jnp.float32), row_tile=8)

    # 3) Packed path with a ragged packed-row tail (100 rows -> 25 packed rows,
    #    tile 8).
    _check(jax.random.normal(k3, (25, 4, 32), dtype=jnp.float32), row_tile=8)

    print("KERNEL_OK")
</pallas_src>

<mosaic_0001>
module attributes {stable_mosaic.version = 11 : i64} {
  func.func @_zen_ln_packed_kernel(%arg0: i32, %arg1: memref<4x128xf32, #tpu.memory_space<vmem>>, %arg2: memref<4x128xf32, #tpu.memory_space<vmem>>, %arg3: memref<4x4xf32, #tpu.memory_space<vmem>>) attributes {dimension_semantics = [#tpu.dimension_semantics<parallel>], iteration_bounds = array<i64: 1>, scalar_prefetch = 0 : i64, scratch_operands = 0 : i64, tpu.core_type = #tpu.core_type<tc>, window_params = [{transform_indices = @transform_0, window_bounds = array<i64: 4, 128>}, {transform_indices = @transform_1, window_bounds = array<i64: 4, 128>}, {transform_indices = @transform_2, window_bounds = array<i64: 4, 4>}]} {
    %c0 = arith.constant 0 : index
    %c0_0 = arith.constant 0 : index
    %0 = vector.load %arg1[%c0, %c0_0] : memref<4x128xf32, #tpu.memory_space<vmem>>, vector<4x128xf32>
    %1 = tpu.iota {dimensions = array<i32: 1>} : vector<1x128xi32>
    %2 = vector.extract_strided_slice %0 {offsets = [0, 1], sizes = [4, 127], strides = [1, 1]} : vector<4x128xf32> to vector<4x127xf32>
    %3 = vector.extract_strided_slice %0 {offsets = [0, 0], sizes = [4, 1], strides = [1, 1]} : vector<4x128xf32> to vector<4x1xf32>
    %4 = tpu.concatenate %2, %3 in 1 : vector<4x127xf32>, vector<4x1xf32> -> vector<4x128xf32>
    %5 = vector.extract_strided_slice %0 {offsets = [0, 127], sizes = [4, 1], strides = [1, 1]} : vector<4x128xf32> to vector<4x1xf32>
    %6 = vector.extract_strided_slice %0 {offsets = [0, 0], sizes = [4, 127], strides = [1, 1]} : vector<4x128xf32> to vector<4x127xf32>
    %7 = tpu.concatenate %5, %6 in 1 : vector<4x1xf32>, vector<4x127xf32> -> vector<4x128xf32>
    %c1_i32 = arith.constant 1 : i32
    %8 = vector.broadcast %c1_i32 : i32 to vector<1x128xi32>
    %9 = arith.andi %1, %8 : vector<1x128xi32>
    %c0_i32 = arith.constant 0 : i32
    %10 = vector.broadcast %c0_i32 : i32 to vector<1x128xi32>
    %11 = arith.cmpi eq, %9, %10 : vector<1x128xi32>
    %12 = vector.shape_cast %11 : vector<1x128xi1> to vector<1x128xi1>
    %13 = vector.broadcast %12 : vector<1x128xi1> to vector<4x128xi1>
    %14 = arith.select %13, %4, %7 : vector<4x128xi1>, vector<4x128xf32>
    %15 = arith.addf %0, %14 : vector<4x128xf32>
    %16 = vector.extract_strided_slice %15 {offsets = [0, 2], sizes = [4, 126], strides = [1, 1]} : vector<4x128xf32> to vector<4x126xf32>
    %17 = vector.extract_strided_slice %15 {offsets = [0, 0], sizes = [4, 2], strides = [1, 1]} : vector<4x128xf32> to vector<4x2xf32>
    %18 = tpu.concatenate %16, %17 in 1 : vector<4x126xf32>, vector<4x2xf32> -> vector<4x128xf32>
    %19 = vector.extract_strided_slice %15 {offsets = [0, 126], sizes = [4, 2], strides = [1, 1]} : vector<4x128xf32> to vector<4x2xf32>
    %20 = vector.extract_strided_slice %15 {offsets = [0, 0], sizes = [4, 126], strides = [1, 1]} : vector<4x128xf32> to vector<4x126xf32>
    %21 = tpu.concatenate %19, %20 in 1 : vector<4x2xf32>, vector<4x126xf32> -> vector<4x128xf32>
    %c2_i32 = arith.constant 2 : i32
    %22 = vector.broadcast %c2_i32 : i32 to vector<1x128xi32>
    %23 = arith.andi %1, %22 : vector<1x128xi32>
    %c0_i32_1 = arith.constant 0 : i32
    %24 = vector.broadcast %c0_i32_1 : i32 to vector<1x128xi32>
    %25 = arith.cmpi eq, %23, %24 : vector<1x128xi32>
    %26 = vector.shape_cast %25 : vector<1x128xi1> to vector<1x128xi1>
    %27 = vector.broadcast %26 : vector<1x128xi1> to vector<4x128xi1>
    %28 = arith.select %27, %18, %21 : vector<4x128xi1>, vector<4x128xf32>
    %29 = arith.addf %15, %28 : vector<4x128xf32>
    %30 = vector.extract_strided_slice %29 {offsets = [0, 4], sizes = [4, 124], strides = [1, 1]} : vector<4x128xf32> to vector<4x124xf32>
    %31 = vector.extract_strided_slice %29 {offsets = [0, 0], sizes = [4, 4], strides = [1, 1]} : vector<4x128xf32> to vector<4x4xf32>
    %32 = tpu.concatenate %30, %31 in 1 : vector<4x124xf32>, vector<4x4xf32> -> vector<4x128xf32>
    %33 = vector.extract_strided_slice %29 {offsets = [0, 124], sizes = [4, 4], strides = [1, 1]} : vector<4x128xf32> to vector<4x4xf32>
    %34 = vector.extract_strided_slice %29 {offsets = [0, 0], sizes = [4, 124], strides = [1, 1]} : vector<4x128xf32> to vector<4x124xf32>
    %35 = tpu.concatenate %33, %34 in 1 : vector<4x4xf32>, vector<4x124xf32> -> vector<4x128xf32>
    %c4_i32 = arith.constant 4 : i32
    %36 = vector.broadcast %c4_i32 : i32 to vector<1x128xi32>
    %37 = arith.andi %1, %36 : vector<1x128xi32>
    %c0_i32_2 = arith.constant 0 : i32
    %38 = vector.broadcast %c0_i32_2 : i32 to vector<1x128xi32>
    %39 = arith.cmpi eq, %37, %38 : vector<1x128xi32>
    %40 = vector.shape_cast %39 : vector<1x128xi1> to vector<1x128xi1>
    %41 = vector.broadcast %40 : vector<1x128xi1> to vector<4x128xi1>
    %42 = arith.select %41, %32, %35 : vector<4x128xi1>, vector<4x128xf32>
    %43 = arith.addf %29, %42 : vector<4x128xf32>
    %44 = vector.extract_strided_slice %43 {offsets = [0, 8], sizes = [4, 120], strides = [1, 1]} : vector<4x128xf32> to vector<4x120xf32>
    %45 = vector.extract_strided_slice %43 {offsets = [0, 0], sizes = [4, 8], strides = [1, 1]} : vector<4x128xf32> to vector<4x8xf32>
    %46 = tpu.concatenate %44, %45 in 1 : vector<4x120xf32>, vector<4x8xf32> -> vector<4x128xf32>
    %47 = vector.extract_strided_slice %43 {offsets = [0, 120], sizes = [4, 8], strides = [1, 1]} : vector<4x128xf32> to vector<4x8xf32>
    %48 = vector.extract_strided_slice %43 {offsets = [0, 0], sizes = [4, 120], strides = [1, 1]} : vector<4x128xf32> to vector<4x120xf32>
    %49 = tpu.concatenate %47, %48 in 1 : vector<4x8xf32>, vector<4x120xf32> -> vector<4x128xf32>
    %c8_i32 = arith.constant 8 : i32
    %50 = vector.broadcast %c8_i32 : i32 to vector<1x128xi32>
    %51 = arith.andi %1, %50 : vector<1x128xi32>
    %c0_i32_3 = arith.constant 0 : i32
    %52 = vector.broadcast %c0_i32_3 : i32 to vector<1x128xi32>
    %53 = arith.cmpi eq, %51, %52 : vector<1x128xi32>
    %54 = vector.shape_cast %53 : vector<1x128xi1> to vector<1x128xi1>
    %55 = vector.broadcast %54 : vector<1x128xi1> to vector<4x128xi1>
    %56 = arith.select %55, %46, %49 : vector<4x128xi1>, vector<4x128xf32>
    %57 = arith.addf %43, %56 : vector<4x128xf32>
    %58 = vector.extract_strided_slice %57 {offsets = [0, 16], sizes = [4, 112], strides = [1, 1]} : vector<4x128xf32> to vector<4x112xf32>
    %59 = vector.extract_strided_slice %57 {offsets = [0, 0], sizes = [4, 16], strides = [1, 1]} : vector<4x128xf32> to vector<4x16xf32>
    %60 = tpu.concatenate %58, %59 in 1 : vector<4x112xf32>, vector<4x16xf32> -> vector<4x128xf32>
    %61 = vector.extract_strided_slice %57 {offsets = [0, 112], sizes = [4, 16], strides = [1, 1]} : vector<4x128xf32> to vector<4x16xf32>
    %62 = vector.extract_strided_slice %57 {offsets = [0, 0], sizes = [4, 112], strides = [1, 1]} : vector<4x128xf32> to vector<4x112xf32>
    %63 = tpu.concatenate %61, %62 in 1 : vector<4x16xf32>, vector<4x112xf32> -> vector<4x128xf32>
    %c16_i32 = arith.constant 16 : i32
    %64 = vector.broadcast %c16_i32 : i32 to vector<1x128xi32>
    %65 = arith.andi %1, %64 : vector<1x128xi32>
    %c0_i32_4 = arith.constant 0 : i32
    %66 = vector.broadcast %c0_i32_4 : i32 to vector<1x128xi32>
    %67 = arith.cmpi eq, %65, %66 : vector<1x128xi32>
    %68 = vector.shape_cast %67 : vector<1x128xi1> to vector<1x128xi1>
    %69 = vector.broadcast %68 : vector<1x128xi1> to vector<4x128xi1>
    %70 = arith.select %69, %60, %63 : vector<4x128xi1>, vector<4x128xf32>
    %71 = arith.addf %57, %70 : vector<4x128xf32>
    %cst = arith.constant 3.125000e-02 : f32
    %72 = vector.broadcast %cst : f32 to vector<4x128xf32>
    %73 = arith.mulf %71, %72 : vector<4x128xf32>
    %74 = arith.subf %0, %73 : vector<4x128xf32>
    %75 = arith.mulf %74, %74 : vector<4x128xf32>
    %76 = vector.extract_strided_slice %75 {offsets = [0, 1], sizes = [4, 127], strides = [1, 1]} : vector<4x128xf32> to vector<4x127xf32>
    %77 = vector.extract_strided_slice %75 {offsets = [0, 0], sizes = [4, 1], strides = [1, 1]} : vector<4x128xf32> to vector<4x1xf32>
    %78 = tpu.concatenate %76, %77 in 1 : vector<4x127xf32>, vector<4x1xf32> -> vector<4x128xf32>
    %79 = vector.extract_strided_slice %75 {offsets = [0, 127], sizes = [4, 1], strides = [1, 1]} : vector<4x128xf32> to vector<4x1xf32>
    %80 = vector.extract_strided_slice %75 {offsets = [0, 0], sizes = [4, 127], strides = [1, 1]} : vector<4x128xf32> to vector<4x127xf32>
    %81 = tpu.concatenate %79, %80 in 1 : vector<4x1xf32>, vector<4x127xf32> -> vector<4x128xf32>
    %c1_i32_5 = arith.constant 1 : i32
    %82 = vector.broadcast %c1_i32_5 : i32 to vector<1x128xi32>
    %83 = arith.andi %1, %82 : vector<1x128xi32>
    %c0_i32_6 = arith.constant 0 : i32
    %84 = vector.broadcast %c0_i32_6 : i32 to vector<1x128xi32>
    %85 = arith.cmpi eq, %83, %84 : vector<1x128xi32>
    %86 = vector.shape_cast %85 : vector<1x128xi1> to vector<1x128xi1>
    %87 = vector.broadcast %86 : vector<1x128xi1> to vector<4x128xi1>
    %88 = arith.select %87, %78, %81 : vector<4x128xi1>, vector<4x128xf32>
    %89 = arith.addf %75, %88 : vector<4x128xf32>
    %90 = vector.extract_strided_slice %89 {offsets = [0, 2], sizes = [4, 126], strides = [1, 1]} : vector<4x128xf32> to vector<4x126xf32>
    %91 = vector.extract_strided_slice %89 {offsets = [0, 0], sizes = [4, 2], strides = [1, 1]} : vector<4x128xf32> to vector<4x2xf32>
    %92 = tpu.concatenate %90, %91 in 1 : vector<4x126xf32>, vector<4x2xf32> -> vector<4x128xf32>
    %93 = vector.extract_strided_slice %89 {offsets = [0, 126], sizes = [4, 2], strides = [1, 1]} : vector<4x128xf32> to vector<4x2xf32>
    %94 = vector.extract_strided_slice %89 {offsets = [0, 0], sizes = [4, 126], strides = [1, 1]} : vector<4x128xf32> to vector<4x126xf32>
    %95 = tpu.concatenate %93, %94 in 1 : vector<4x2xf32>, vector<4x126xf32> -> vector<4x128xf32>
    %c2_i32_7 = arith.constant 2 : i32
    %96 = vector.broadcast %c2_i32_7 : i32 to vector<1x128xi32>
    %97 = arith.andi %1, %96 : vector<1x128xi32>
    %c0_i32_8 = arith.constant 0 : i32
    %98 = vector.broadcast %c0_i32_8 : i32 to vector<1x128xi32>
    %99 = arith.cmpi eq, %97, %98 : vector<1x128xi32>
    %100 = vector.shape_cast %99 : vector<1x128xi1> to vector<1x128xi1>
    %101 = vector.broadcast %100 : vector<1x128xi1> to vector<4x128xi1>
    %102 = arith.select %101, %92, %95 : vector<4x128xi1>, vector<4x128xf32>
    %103 = arith.addf %89, %102 : vector<4x128xf32>
    %104 = vector.extract_strided_slice %103 {offsets = [0, 4], sizes = [4, 124], strides = [1, 1]} : vector<4x128xf32> to vector<4x124xf32>
    %105 = vector.extract_strided_slice %103 {offsets = [0, 0], sizes = [4, 4], strides = [1, 1]} : vector<4x128xf32> to vector<4x4xf32>
    %106 = tpu.concatenate %104, %105 in 1 : vector<4x124xf32>, vector<4x4xf32> -> vector<4x128xf32>
    %107 = vector.extract_strided_slice %103 {offsets = [0, 124], sizes = [4, 4], strides = [1, 1]} : vector<4x128xf32> to vector<4x4xf32>
    %108 = vector.extract_strided_slice %103 {offsets = [0, 0], sizes = [4, 124], strides = [1, 1]} : vector<4x128xf32> to vector<4x124xf32>
    %109 = tpu.concatenate %107, %108 in 1 : vector<4x4xf32>, vector<4x124xf32> -> vector<4x128xf32>
    %c4_i32_9 = arith.constant 4 : i32
    %110 = vector.broadcast %c4_i32_9 : i32 to vector<1x128xi32>
    %111 = arith.andi %1, %110 : vector<1x128xi32>
    %c0_i32_10 = arith.constant 0 : i32
    %112 = vector.broadcast %c0_i32_10 : i32 to vector<1x128xi32>
    %113 = arith.cmpi eq, %111, %112 : vector<1x128xi32>
    %114 = vector.shape_cast %113 : vector<1x128xi1> to vector<1x128xi1>
    %115 = vector.broadcast %114 : vector<1x128xi1> to vector<4x128xi1>
    %116 = arith.select %115, %106, %109 : vector<4x128xi1>, vector<4x128xf32>
    %117 = arith.addf %103, %116 : vector<4x128xf32>
    %118 = vector.extract_strided_slice %117 {offsets = [0, 8], sizes = [4, 120], strides = [1, 1]} : vector<4x128xf32> to vector<4x120xf32>
    %119 = vector.extract_strided_slice %117 {offsets = [0, 0], sizes = [4, 8], strides = [1, 1]} : vector<4x128xf32> to vector<4x8xf32>
    %120 = tpu.concatenate %118, %119 in 1 : vector<4x120xf32>, vector<4x8xf32> -> vector<4x128xf32>
    %121 = vector.extract_strided_slice %117 {offsets = [0, 120], sizes = [4, 8], strides = [1, 1]} : vector<4x128xf32> to vector<4x8xf32>
    %122 = vector.extract_strided_slice %117 {offsets = [0, 0], sizes = [4, 120], strides = [1, 1]} : vector<4x128xf32> to vector<4x120xf32>
    %123 = tpu.concatenate %121, %122 in 1 : vector<4x8xf32>, vector<4x120xf32> -> vector<4x128xf32>
    %c8_i32_11 = arith.constant 8 : i32
    %124 = vector.broadcast %c8_i32_11 : i32 to vector<1x128xi32>
    %125 = arith.andi %1, %124 : vector<1x128xi32>
    %c0_i32_12 = arith.constant 0 : i32
    %126 = vector.broadcast %c0_i32_12 : i32 to vector<1x128xi32>
    %127 = arith.cmpi eq, %125, %126 : vector<1x128xi32>
    %128 = vector.shape_cast %127 : vector<1x128xi1> to vector<1x128xi1>
    %129 = vector.broadcast %128 : vector<1x128xi1> to vector<4x128xi1>
    %130 = arith.select %129, %120, %123 : vector<4x128xi1>, vector<4x128xf32>
    %131 = arith.addf %117, %130 : vector<4x128xf32>
    %132 = vector.extract_strided_slice %131 {offsets = [0, 16], sizes = [4, 112], strides = [1, 1]} : vector<4x128xf32> to vector<4x112xf32>
    %133 = vector.extract_strided_slice %131 {offsets = [0, 0], sizes = [4, 16], strides = [1, 1]} : vector<4x128xf32> to vector<4x16xf32>
    %134 = tpu.concatenate %132, %133 in 1 : vector<4x112xf32>, vector<4x16xf32> -> vector<4x128xf32>
    %135 = vector.extract_strided_slice %131 {offsets = [0, 112], sizes = [4, 16], strides = [1, 1]} : vector<4x128xf32> to vector<4x16xf32>
    %136 = vector.extract_strided_slice %131 {offsets = [0, 0], sizes = [4, 112], strides = [1, 1]} : vector<4x128xf32> to vector<4x112xf32>
    %137 = tpu.concatenate %135, %136 in 1 : vector<4x16xf32>, vector<4x112xf32> -> vector<4x128xf32>
    %c16_i32_13 = arith.constant 16 : i32
    %138 = vector.broadcast %c16_i32_13 : i32 to vector<1x128xi32>
    %139 = arith.andi %1, %138 : vector<1x128xi32>
    %c0_i32_14 = arith.constant 0 : i32
    %140 = vector.broadcast %c0_i32_14 : i32 to vector<1x128xi32>
    %141 = arith.cmpi eq, %139, %140 : vector<1x128xi32>
    %142 = vector.shape_cast %141 : vector<1x128xi1> to vector<1x128xi1>
    %143 = vector.broadcast %142 : vector<1x128xi1> to vector<4x128xi1>
    %144 = arith.select %143, %134, %137 : vector<4x128xi1>, vector<4x128xf32>
    %145 = arith.addf %131, %144 : vector<4x128xf32>
    %cst_15 = arith.constant 3.125000e-02 : f32
    %146 = vector.broadcast %cst_15 : f32 to vector<4x128xf32>
    %147 = arith.mulf %145, %146 : vector<4x128xf32>
    %cst_16 = arith.constant 9.99999974E-6 : f32
    %148 = vector.broadcast %cst_16 : f32 to vector<4x128xf32>
    %149 = arith.addf %147, %148 : vector<4x128xf32>
    %150 = math.rsqrt %149 : vector<4x128xf32>
    %151 = arith.mulf %74, %150 : vector<4x128xf32>
    %c0_17 = arith.constant 0 : index
    %c0_18 = arith.constant 0 : index
    %152 = vector.load %arg2[%c0_17, %c0_18] : memref<4x128xf32, #tpu.memory_space<vmem>>, vector<4x128xf32>
    tpu.vector_store %arg2[%c0_17, %c0_18], %151 {strides = array<i32>} : memref<4x128xf32, #tpu.memory_space<vmem>>, vector<4x128xf32>,
    %153 = vector.extract_strided_slice %147 {offsets = [0, 0], sizes = [4, 1], strides = [1, 1]} : vector<4x128xf32> to vector<4x1xf32>
    %154 = vector.extract_strided_slice %147 {offsets = [0, 32], sizes = [4, 1], strides = [1, 1]} : vector<4x128xf32> to vector<4x1xf32>
    %155 = vector.extract_strided_slice %147 {offsets = [0, 64], sizes = [4, 1], strides = [1, 1]} : vector<4x128xf32> to vector<4x1xf32>
    %156 = vector.extract_strided_slice %147 {offsets = [0, 96], sizes = [4, 1], strides = [1, 1]} : vector<4x128xf32> to vector<4x1xf32>
    %157 = tpu.concatenate %153, %154, %155, %156 in 1 : vector<4x1xf32>, vector<4x1xf32>, vector<4x1xf32>, vector<4x1xf32> -> vector<4x4xf32>
    %c0_19 = arith.constant 0 : index
    %c0_20 = arith.constant 0 : index
    %158 = vector.load %arg3[%c0_19, %c0_20] : memref<4x4xf32, #tpu.memory_space<vmem>>, vector<4x4xf32>
    tpu.vector_store %arg3[%c0_19, %c0_20], %157 {strides = array<i32>} : memref<4x4xf32, #tpu.memory_space<vmem>>, vector<4x4xf32>,
    return
  }
  func.func @transform_0(%arg0: i32) -> (i32, i32) {
    %c0_i32 = arith.constant 0 : i32
    %c0_i32_0 = arith.constant 0 : i32
    return %arg0, %c0_i32 : i32, i32
  }
  func.func @transform_1(%arg0: i32) -> (i32, i32) {
    %c0_i32 = arith.constant 0 : i32
    %c0_i32_0 = arith.constant 0 : i32
    return %arg0, %c0_i32 : i32, i32
  }
  func.func @transform_2(%arg0: i32) -> (i32, i32) {
    %c0_i32 = arith.constant 0 : i32
    %c0_i32_0 = arith.constant 0 : i32
    return %arg0, %c0_i32 : i32, i32
  }
}

</mosaic_0001>

<bundles_post_ra>
// kernel: zen_layer_norm.1
= control target key start
LH: loop header
LB: loop body
LE: loop exit
PB: predicated region body
PF: predicated region fallthrough
CT: control target
= control target key end

     0   :  { %s172_s11 = smov 127   ;;  %s173_s12 = smov 1   ;;  %v11_v1 = vlaneseq  ;;  %vm20_vm5 = vcmask 7168   ;;  %vm34_vm6 = vcmask 15360   ;;  %vm145_vm7 = vcmask 23552   ;;  %s269_s0 = inlined_call_operand.vmem [shape: f32[4,128], index: 0, kind: input, shape index: {}]   ;;  %s270_s1 = inlined_call_operand.vmem [shape: f32[4,128], index: 1, kind: output, shape index: {0}]   ;;  %s271_s2 = inlined_call_operand.vmem [shape: f32[4,4], index: 2, kind: output, shape index: {1}]  }
   0x1   :  { %v10_v0 = vld [vmem:[%s269_s0] sm:$0xf]  ;;  %s174_s0 = smov 126   ;;  %s175_s13 = smov 2   ;;  %vm147_vm8 = vcmask 27648  }
   0x2   :  { %14 = vrot.lane.b32.xlu0 %v10_v0, %s172_s11  ;;  %v12_v2 = vand.u32 127, %v11_v1  ;;  %s176_s14 = smov 4   ;;  %s177_s15 = smov 124  }
   0x3   :  { %s178_s16 = smov 8   ;;  %s179_s17 = smov 120  }
   0x4   :  { %v21_v3 = vand.u32 1, %v12_v2  ;;  %v35_v9 = vand.u32 2, %v12_v2  ;;  %v48_v15 = vand.u32 4, %v12_v2  ;;  %v61_v21 = vand.u32 8, %v12_v2  ;;  %s180_s18 = smov 16   ;;  %s181_s19 = smov 112  }
   0x5   :  { %v74_v27 = vand.u32 16, %v12_v2  ;;  %s182_s20 = smov 66   ;;  %s183_s21 = smov 97  }
   0x6   :  { %17 = vrot.lane.b32.xlu0 %v10_v0, %s173_s12  ;;  %vm205_vm0 = vcmp.eq.s32.totalorder %v21_v3, 0  ;;  %vm213_vm1 = vcmp.eq.s32.totalorder %v35_v9, 0  ;;  %vm221_vm2 = vcmp.eq.s32.totalorder %v48_v15, 0  ;;  %vm229_vm3 = vcmp.eq.s32.totalorder %v61_v21, 0  ;;  %s184_s22 = smov 35  }
   0x7   :  { %vm237_vm4 = vcmp.eq.s32.totalorder %v74_v27, 0 }
  0x74   :  { %v15_v4 = vpop.permute.xlu0 %14 }
  0x78   :  { %v18_v6 = vpop.permute.xlu0 %17 }
  0x79   :  { %v25_v7 = vsel %vm205_vm0, %v15_v4, %v18_v6 }
  0x7a   :  { %v26_v8 = vadd.f32 %v25_v7, %v10_v0 }
  0x7c   :  { %28 = vrot.lane.b32.xlu1 %v26_v8, %s174_s0 }
  0x80   :  { %31 = vrot.lane.b32.xlu1 %v26_v8, %s175_s13 }
  0xee   :  { %v29_v10 = vpop.permute.xlu1 %28 }
  0xf2   :  { %v32_v12 = vpop.permute.xlu1 %31 }
  0xf3   :  { %v39_v13 = vsel %vm213_vm1, %v29_v10, %v32_v12 }
  0xf4   :  { %v40_v14 = vadd.f32 %v39_v13, %v26_v8 }
  0xf6   :  { %45 = vrot.lane.b32.xlu1 %v40_v14, %s176_s14  ;;  %42 = vrot.lane.b32.xlu0 %v40_v14, %s177_s15 }
 0x168   :  { %v46_v17 = vpop.permute.xlu1 %45  ;;  %v43_v18 = vpop.permute.xlu0 %42 }
 0x169   :  { %v52_v19 = vsel %vm221_vm2, %v43_v18, %v46_v17 }
 0x16a   :  { %v53_v20 = vadd.f32 %v52_v19, %v40_v14 }
 0x16c   :  { %58 = vrot.lane.b32.xlu1 %v53_v20, %s178_s16  ;;  %55 = vrot.lane.b32.xlu0 %v53_v20, %s179_s17 }
 0x1de   :  { %v59_v23 = vpop.permute.xlu1 %58  ;;  %v56_v24 = vpop.permute.xlu0 %55 }
 0x1df   :  { %v65_v25 = vsel %vm229_vm3, %v56_v24, %v59_v23 }
 0x1e0   :  { %v66_v26 = vadd.f32 %v65_v25, %v53_v20 }
 0x1e2   :  { %71 = vrot.lane.b32.xlu1 %v66_v26, %s180_s18  ;;  %68 = vrot.lane.b32.xlu0 %v66_v26, %s181_s19 }
 0x254   :  { %v72_v29 = vpop.permute.xlu1 %71  ;;  %v69_v30 = vpop.permute.xlu0 %68 }
 0x255   :  { %v78_v31 = vsel %vm237_vm4, %v69_v30, %v72_v29 }
 0x256   :  { %v79_v32 = vadd.f32 %v78_v31, %v66_v26 }
 0x258   :  { %v80_v33 = vmul.f32 0.03125, %v79_v32 }
 0x25a   :  { %v81_v34 = vsub.f32 %v10_v0, %v80_v33 }
 0x25c   :  { %v82_v35 = vmul.f32 %v81_v34, %v81_v34 }
 0x25e   :  { %87 = vrot.lane.b32.xlu1 %v82_v35, %s173_s12  ;;  %84 = vrot.lane.b32.xlu0 %v82_v35, %s172_s11 }
 0x2d0   :  { %v88_v36 = vpop.permute.xlu1 %87  ;;  %v85_v37 = vpop.permute.xlu0 %84 }
 0x2d1   :  { %v90_v38 = vsel %vm205_vm0, %v85_v37, %v88_v36 }
 0x2d2   :  { %v91_v39 = vadd.f32 %v90_v38, %v82_v35 }
 0x2d4   :  { %96 = vrot.lane.b32.xlu1 %v91_v39, %s175_s13  ;;  %93 = vrot.lane.b32.xlu0 %v91_v39, %s174_s0 }
 0x346   :  { %v97_v40 = vpop.permute.xlu1 %96  ;;  %v94_v41 = vpop.permute.xlu0 %93 }
 0x347   :  { %v99_v42 = vsel %vm213_vm1, %v94_v41, %v97_v40 }
 0x348   :  { %v100_v43 = vadd.f32 %v99_v42, %v91_v39 }
 0x34a   :  { %105 = vrot.lane.b32.xlu1 %v100_v43, %s176_s14  ;;  %102 = vrot.lane.b32.xlu0 %v100_v43, %s177_s15 }
 0x3bc   :  { %v106_v44 = vpop.permute.xlu1 %105  ;;  %v103_v45 = vpop.permute.xlu0 %102 }
 0x3bd   :  { %v108_v46 = vsel %vm221_vm2, %v103_v45, %v106_v44 }
 0x3be   :  { %v109_v47 = vadd.f32 %v108_v46, %v100_v43 }
 0x3c0   :  { %114 = vrot.lane.b32.xlu1 %v109_v47, %s178_s16  ;;  %111 = vrot.lane.b32.xlu0 %v109_v47, %s179_s17 }
 0x432   :  { %v115_v48 = vpop.permute.xlu1 %114  ;;  %v112_v49 = vpop.permute.xlu0 %111 }
 0x433   :  { %v117_v50 = vsel %vm229_vm3, %v112_v49, %v115_v48 }
 0x434   :  { %v118_v51 = vadd.f32 %v117_v50, %v109_v47 }
 0x436   :  { %123 = vrot.lane.b32.xlu1 %v118_v51, %s180_s18  ;;  %120 = vrot.lane.b32.xlu0 %v118_v51, %s181_s19 }
 0x4a8   :  { %v124_v52 = vpop.permute.xlu1 %123  ;;  %v121_v53 = vpop.permute.xlu0 %120 }
 0x4a9   :  { %v126_v54 = vsel %vm237_vm4, %v121_v53, %v124_v52 }
 0x4aa   :  { %v127_v55 = vadd.f32 %v126_v54, %v118_v51 }
 0x4ac   :  { %v128_v56 = vmul.f32 0.03125, %v127_v55 }
 0x4ae   :  { %v129_v57 = vadd.f32 1e-05, %v128_v56  ;;  %137 = vrot.lane.b32.xlu1 %v128_v56, %s182_s20  ;;  %134 = vrot.lane.b32.xlu0 %v128_v56, %s183_s21 }
 0x4b0   :  { %170 = vrsqrt.f32 %v129_v57 }
 0x4b2   :  { %140 = vrot.lane.b32.xlu0 %v128_v56, %s184_s22 }
 0x4ba   :  { %v171_v58 = vpop.eup %170 }
 0x4bb   :  { %v131_v59 = vmul.f32 %v171_v58, %v81_v34 }
 0x4bd   :  { %132 = vst [vmem:[%s270_s1] sm:$0xf] %v131_v59 }
 0x520   :  { %v135_v60 = vpop.permute.xlu0 %134  ;;  %v138_v61 = vpop.permute.xlu1 %137 }
 0x521   :  { %v143_v62 = vsel %vm20_vm5, %v128_v56, %v135_v60 }
 0x522   :  { %v144_v63 = vsel %vm34_vm6, %v143_v62, %v138_v61 }
 0x524   :  { %v141_v0 = vpop.permute.xlu0 %140 }
 0x525   :  { %v146_v1 = vsel %vm145_vm7, %v144_v63, %v141_v0 }
 0x526   :  { %148 = vst.msk [vmem:[%s271_s2] sm:$0xf] %vm147_vm8, %v146_v1 }

</bundles_post_ra>
